<compile_context>
chip_gen: v5e
topology: v5e:2x2
jax: 0.10.0
libtpu: 0.0.40
codegen_flags: <defaults>
</compile_context>

<pallas_src>
import functools

import numpy as np
import jax
import jax.numpy as jnp
from jax import lax
from jax.experimental import pallas as pl
from jax.experimental.pallas import tpu as pltpu


_VMEM_LIMIT_BYTES = 48 * 1024 * 1024    # safe on v5e/v6e (128 MiB) and v7x (64 MiB)
_WORKING_SET_BYTES = 24 * 1024 * 1024   # per-step tile budget (inputs + intermediates)


# --------------------------------------------------------------------------
# Kernels
# --------------------------------------------------------------------------
def _tile_loss(adj, target_ref, out_ref, *, true_b, tb, ragged):
    """Per-tile cross entropy: writes the sum of per-row losses for valid rows.

    adj        : (TB, C) compute dtype (bf16 on v6e/v7x bf16 path, else f32),
                 already logit-adjusted if balance=True.
    target_ref : (TB, 1) i32
    out_ref    : (1, 1, 128) f32 block; tile sum splat into it (lane-dense
                 store; finalized to the scalar mean in the JAX wrapper).
    """
    # Numerically stable logsumexp over the class (lane) axis.  max / subtract
    # / exp run in the compute dtype (packed bf16 VPU+EUP on v6e/v7x); the
    # cross-class accumulation and the log stay in f32.
    m = jnp.max(adj, axis=-1, keepdims=True)                           # (TB, 1)
    e = jnp.exp(adj - m)                                               # (TB, C)
    sum_e = jnp.sum(e, axis=-1, keepdims=True, dtype=jnp.float32)      # (TB, 1)
    lse = m.astype(jnp.float32) + jnp.log(sum_e)                       # (TB, 1)

    # Gather adj[b, target[b]] via compare + select + lane reduce (no MXU).
    tgt = target_ref[...]                                              # (TB, 1)
    col = lax.broadcasted_iota(jnp.int32, adj.shape, 1)                # (TB, C)
    picked = jnp.sum(jnp.where(col == tgt, adj, jnp.zeros((), adj.dtype)),
                     axis=-1, keepdims=True, dtype=jnp.float32)        # (TB, 1)

    per_sample = lse - picked                                          # (TB, 1)

    # Ragged last tile: Pallas feeds undefined data for rows >= true_b.  Every
    # row's math above is row-local, so masking the (TB, 1) column BEFORE the
    # cross-row sum is sufficient (do not move this after the sum).  `ragged`
    # is a Python flag -> zero cost when B % tb == 0.
    if ragged:
        row = pl.program_id(0) * tb + lax.broadcasted_iota(
            jnp.int32, per_sample.shape, 0)
        per_sample = jnp.where(row < true_b, per_sample, 0.0)

    out_ref[...] = jnp.full(out_ref.shape, jnp.sum(per_sample), jnp.float32)


def _ce_kernel_balanced(adjust_ref, logits_ref, target_ref, out_ref, *,
                        compute_dtype, true_b, tb, ragged):
    adj = logits_ref[...].astype(compute_dtype) + adjust_ref[...]
    _tile_loss(adj, target_ref, out_ref, true_b=true_b, tb=tb, ragged=ragged)


def _ce_kernel_plain(logits_ref, target_ref, out_ref, *,
                     compute_dtype, true_b, tb, ragged):
    adj = logits_ref[...].astype(compute_dtype)
    _tile_loss(adj, target_ref, out_ref, true_b=true_b, tb=tb, ragged=ragged)


# --------------------------------------------------------------------------
# Wrapper
# --------------------------------------------------------------------------
def _round_up(x, m):
    return ((x + m - 1) // m) * m


def _choose_tb(batch, num_classes, in_itemsize, compute_itemsize):
    """Pick the batch-tile row count from a VMEM byte budget.

    The budget counts the real footprint: the double-buffered native-dtype
    logits block plus ~3 compute-dtype intermediates (adjusted logits, exp,
    one-hot select) and the int32 class iota -- not just the input block.
    """
    per_row = num_classes * (2 * in_itemsize + 3 * compute_itemsize + 4)
    rows = _WORKING_SET_BYTES // max(1, per_row)
    rows = max(8, (rows // 8) * 8)
    # Keep >= 2 batch tiles whenever possible so the "parallel" grid axis
    # actually splits across v7x's two TensorCores.
    if batch > 8:
        rows = min(rows, _round_up(-(-batch // 2), 8))
    rows = min(rows, _round_up(batch, 8))
    return max(8, rows)


def custom_loss(output_logits, target, prior, balance=False, tb=None,
                compute_dtype=None):
    """Pallas equivalent of CustomLoss.forward (basic_loss = CrossEntropyLoss,
    mean reduction).

    compute_dtype: dtype for the pre-softmax elementwise work.  Defaults to
    bf16 when the logits are bf16 (packed bf16 VPU/EUP on v6e/v7x; sum-exp and
    lse still accumulate in f32), else f32.  Pass jnp.float32 explicitly on
    v5e (no bf16 VPU/EUP) or when full f32 accuracy is required.
    """
    B, C = output_logits.shape
    in_itemsize = jnp.dtype(output_logits.dtype).itemsize
    if compute_dtype is None:
        compute_dtype = (jnp.bfloat16 if output_logits.dtype == jnp.bfloat16
                         else jnp.float32)
    compute_itemsize = jnp.dtype(compute_dtype).itemsize

    if tb is None:
        tb = _choose_tb(B, C, in_itemsize, compute_itemsize)
    tb = max(8, (tb // 8) * 8)
    num_tiles = pl.cdiv(B, tb)
    # No wrapper-side jnp.pad: the ragged last block is handled by Pallas
    # partial blocks plus the in-kernel row mask.
    ragged = (B % tb) != 0

    tgt = target.astype(jnp.int32).reshape(B, 1)

    in_specs = [
        pl.BlockSpec((tb, C), lambda i: (i, 0)),     # logits tile (native dtype)
        pl.BlockSpec((tb, 1), lambda i: (i, 0)),     # target tile (narrow DMA; ok)
    ]
    args = [output_logits, tgt]
    kern_kwargs = dict(compute_dtype=compute_dtype, true_b=B, tb=tb,
                       ragged=ragged)

    if balance:
        # Precompute log(prior + 1e-9) once, already cast to the compute dtype,
        # so the (1, C) adjustment block is DMA'd once and stays VMEM-resident.
        adjust = jnp.log(prior.astype(jnp.float32) + 1e-9).reshape(1, C)
        adjust = adjust.astype(compute_dtype)
        in_specs = [pl.BlockSpec((1, C), lambda i: (0, 0))] + in_specs
        args = [adjust] + args
        kernel = functools.partial(_ce_kernel_balanced, **kern_kwargs)
    else:
        kernel = functools.partial(_ce_kernel_plain, **kern_kwargs)

    cost = pl.CostEstimate(
        flops=int(5 * B * C),
        transcendentals=int(B * C + B),
        bytes_accessed=int(B * C * in_itemsize + B * 4 + num_tiles * 128 * 4),
    )

    partials = pl.pallas_call(
        kernel,
        out_shape=jax.ShapeDtypeStruct((num_tiles, 1, 128), jnp.float32),
        grid_spec=pltpu.PrefetchScalarGridSpec(
            num_scalar_prefetch=0,
            grid=(num_tiles,),
            in_specs=in_specs,
            out_specs=pl.BlockSpec((1, 1, 128), lambda i: (i, 0, 0)),
        ),
        compiler_params=pltpu.CompilerParams(
            dimension_semantics=("parallel",),       # batch tiles independent
            vmem_limit_bytes=_VMEM_LIMIT_BYTES),
        cost_estimate=cost,
    )(*args)

    # Finalize: per-tile partial sums -> mean over the true batch size.
    return jnp.sum(partials[:, 0, 0]) / B


# --------------------------------------------------------------------------
# Pure-JAX reference & demo
# --------------------------------------------------------------------------
def _reference_loss(logits, target, prior, balance, compute_dtype=jnp.float32):
    """CE reference; with compute_dtype it mirrors the kernel's mixed-precision
    path (elementwise in compute dtype, accumulation/log in f32)."""
    x = logits.astype(compute_dtype)
    if balance:
        x = x + jnp.log(prior.astype(jnp.float32) + 1e-9).astype(compute_dtype)
    m = jnp.max(x, axis=-1, keepdims=True)
    sum_e = jnp.sum(jnp.exp(x - m), axis=-1, keepdims=True, dtype=jnp.float32)
    lse = (m.astype(jnp.float32) + jnp.log(sum_e))[:, 0]
    picked = jnp.take_along_axis(x, target[:, None],
                                 axis=-1).astype(jnp.float32)[:, 0]
    return jnp.mean(lse - picked)


if __name__ == "__main__":
    key = jax.random.PRNGKey(0)

    # Small shapes consistent with the module: batch=8, classes=32.
    B, C = 8, 32
    k1, k2, k3, k4 = jax.random.split(key, 4)
    logits = jax.random.normal(k1, (B, C), dtype=jnp.float32)
    target = jax.random.randint(k2, (B,), 0, C, dtype=jnp.int32)

    # Deterministic class counts -> prior (mirrors torch.tensor(clsnm)/sum).
    clsnm = np.arange(1, C + 1, dtype=np.float32)
    prior = jnp.asarray(clsnm / clsnm.sum(), dtype=jnp.float32)

    # balance=True (logit-adjusted CE) and balance=False (plain CE), f32 path.
    loss_bal = custom_loss(logits, target, prior, balance=True)
    jax.block_until_ready(loss_bal)
    loss_plain = custom_loss(logits, target, prior, balance=False)
    jax.block_until_ready(loss_plain)

    assert np.allclose(np.asarray(loss_bal),
                       np.asarray(_reference_loss(logits, target, prior, True)),
                       rtol=1e-5, atol=1e-5)
    assert np.allclose(np.asarray(loss_plain),
                       np.asarray(_reference_loss(logits, target, prior, False)),
                       rtol=1e-5, atol=1e-5)

    # Multi-tile + ragged-last-tile path (forced small tile, B not /8, no pad).
    B2 = 20
    logits2 = jax.random.normal(k3, (B2, C), dtype=jnp.float32)
    target2 = jax.random.randint(k4, (B2,), 0, C, dtype=jnp.int32)
    loss_tiled = custom_loss(logits2, target2, prior, balance=True, tb=8)
    jax.block_until_ready(loss_tiled)
    assert np.allclose(np.asarray(loss_tiled),
                       np.asarray(_reference_loss(logits2, target2, prior, True)),
                       rtol=1e-5, atol=1e-5)

    # Native-bf16 logits path: bf16 DMA + bf16 VPU/EUP elementwise, f32
    # accumulation.  Compared against (a) a mixed-precision-mirroring reference
    # and (b) the plain f32 reference with a looser tolerance.
    logits_bf16 = logits.astype(jnp.bfloat16)
    loss_bf16 = custom_loss(logits_bf16, target, prior, balance=True)
    jax.block_until_ready(loss_bf16)
    ref_bf16 = _reference_loss(logits_bf16, target, prior, True,
                               compute_dtype=jnp.bfloat16)
    assert np.allclose(np.asarray(loss_bf16), np.asarray(ref_bf16),
                       rtol=3e-2, atol=3e-2)
    assert np.allclose(np.asarray(loss_bf16),
                       np.asarray(_reference_loss(logits_bf16, target, prior, True)),
                       rtol=5e-2, atol=5e-2)

    print("KERNEL_OK")
</pallas_src>

<mosaic_0001>
module attributes {stable_mosaic.version = 11 : i64} {
  func.func @_ce_kernel_balanced(%arg0: i32, %arg1: memref<1x32xf32, #tpu.memory_space<vmem>>, %arg2: memref<8x32xf32, #tpu.memory_space<vmem>>, %arg3: memref<8x1xi32, #tpu.memory_space<vmem>>, %arg4: memref<1x1x128xf32, #tpu.memory_space<vmem>>) attributes {dimension_semantics = [#tpu.dimension_semantics<parallel>], iteration_bounds = array<i64: 1>, scalar_prefetch = 0 : i64, scratch_operands = 0 : i64, tpu.core_type = #tpu.core_type<tc>, window_params = [{pipeline_mode = #tpu.pipeline_mode<synchronous>, transform_indices = @transform_0, window_bounds = array<i64: 1, 32>}, {transform_indices = @transform_1, window_bounds = array<i64: 8, 32>}, {transform_indices = @transform_2, window_bounds = array<i64: 8, 1>}, {transform_indices = @transform_3, window_bounds = array<i64: 1, 1, 128>}]} {
    %c0 = arith.constant 0 : index
    %c0_0 = arith.constant 0 : index
    %0 = vector.load %arg2[%c0, %c0_0] : memref<8x32xf32, #tpu.memory_space<vmem>>, vector<8x32xf32>
    %c0_1 = arith.constant 0 : index
    %c0_2 = arith.constant 0 : index
    %1 = vector.load %arg1[%c0_1, %c0_2] : memref<1x32xf32, #tpu.memory_space<vmem>>, vector<1x32xf32>
    %2 = vector.broadcast %1 : vector<1x32xf32> to vector<8x32xf32>
    %3 = arith.addf %0, %2 : vector<8x32xf32>
    %cst = arith.constant dense<0xFF800000> : vector<8xf32>
    %4 = vector.multi_reduction <maximumf>, %3, %cst [1] : vector<8x32xf32> to vector<8xf32>
    %5 = vector.shape_cast %4 : vector<8xf32> to vector<8x1xf32>
    %6 = vector.broadcast %5 : vector<8x1xf32> to vector<8x32xf32>
    %7 = arith.subf %3, %6 : vector<8x32xf32>
    %8 = math.exp %7 : vector<8x32xf32>
    %cst_3 = arith.constant dense<0.000000e+00> : vector<8xf32>
    %9 = vector.multi_reduction <add>, %8, %cst_3 [1] : vector<8x32xf32> to vector<8xf32>
    %10 = vector.shape_cast %9 : vector<8xf32> to vector<8x1xf32>
    %11 = math.log %10 : vector<8x1xf32>
    %12 = arith.addf %5, %11 : vector<8x1xf32>
    %c0_4 = arith.constant 0 : index
    %c0_5 = arith.constant 0 : index
    %13 = vector.load %arg3[%c0_4, %c0_5] : memref<8x1xi32, #tpu.memory_space<vmem>>, vector<8x1xi32>
    %14 = tpu.iota {dimensions = array<i32: 1>} : vector<8x32xi32>
    %15 = vector.broadcast %13 : vector<8x1xi32> to vector<8x32xi32>
    %16 = arith.cmpi eq, %14, %15 : vector<8x32xi32>
    %cst_6 = arith.constant 0.000000e+00 : f32
    %17 = vector.broadcast %cst_6 : f32 to vector<8x32xf32>
    %18 = arith.select %16, %3, %17 : vector<8x32xi1>, vector<8x32xf32>
    %cst_7 = arith.constant dense<0.000000e+00> : vector<8xf32>
    %19 = vector.multi_reduction <add>, %18, %cst_7 [1] : vector<8x32xf32> to vector<8xf32>
    %20 = vector.shape_cast %19 : vector<8xf32> to vector<8x1xf32>
    %21 = arith.subf %12, %20 : vector<8x1xf32>
    %22 = vector.shape_cast %21 : vector<8x1xf32> to vector<1x8x1xf32>
    %cst_8 = arith.constant dense<0.000000e+00> : vector<1xf32>
    %23 = vector.multi_reduction <add>, %22, %cst_8 [1, 2] : vector<1x8x1xf32> to vector<1xf32>
    %24 = vector.shape_cast %23 : vector<1xf32> to vector<1x1x1xf32>
    %25 = vector.extract %24[0, 0, 0] : f32 from vector<1x1x1xf32>
    %26 = vector.broadcast %25 : f32 to vector<1x1x128xf32>
    %c0_9 = arith.constant 0 : index
    %c0_10 = arith.constant 0 : index
    %c0_11 = arith.constant 0 : index
    %27 = vector.load %arg4[%c0_9, %c0_10, %c0_11] : memref<1x1x128xf32, #tpu.memory_space<vmem>>, vector<1x1x128xf32>
    tpu.vector_store %arg4[%c0_9, %c0_10, %c0_11], %26 {strides = array<i32>} : memref<1x1x128xf32, #tpu.memory_space<vmem>>, vector<1x1x128xf32>,
    return
  }
  func.func @transform_0(%arg0: i32) -> (i32, i32) {
    %c0_i32 = arith.constant 0 : i32
    %c0_i32_0 = arith.constant 0 : i32
    %c0_i32_1 = arith.constant 0 : i32
    return %c0_i32, %c0_i32_0 : i32, i32
  }
  func.func @transform_1(%arg0: i32) -> (i32, i32) {
    %c0_i32 = arith.constant 0 : i32
    %c0_i32_0 = arith.constant 0 : i32
    return %arg0, %c0_i32 : i32, i32
  }
  func.func @transform_2(%arg0: i32) -> (i32, i32) {
    %c0_i32 = arith.constant 0 : i32
    %c0_i32_0 = arith.constant 0 : i32
    return %arg0, %c0_i32 : i32, i32
  }
  func.func @transform_3(%arg0: i32) -> (i32, i32, i32) {
    %c0_i32 = arith.constant 0 : i32
    %c0_i32_0 = arith.constant 0 : i32
    %c0_i32_1 = arith.constant 0 : i32
    return %arg0, %c0_i32, %c0_i32_0 : i32, i32, i32
  }
}

</mosaic_0001>

<bundles_post_ra>
// kernel: tpu_custom_call.1
= control target key start
LH: loop header
LB: loop body
LE: loop exit
PB: predicated region body
PF: predicated region fallthrough
CT: control target
= control target key end

     0   :  { %vm21_vm0 = vcmask 261120   ;;  %s148_s0 = inlined_call_operand.vmem [shape: f32[1,32], index: 0, kind: input, shape index: {}]   ;;  %s149_s1 = inlined_call_operand.vmem [shape: f32[8,32], index: 1, kind: input, shape index: {}]   ;;  %s150_s2 = inlined_call_operand.vmem [shape: s32[8,1], index: 2, kind: input, shape index: {}]   ;;  %s151_s3 = inlined_call_operand.hbm [shape: f32[1,1,128], index: 3, kind: output, shape index: {}]  }
   0x1   :  { %v15_v0 = vld [vmem:[%s149_s1] sm:$0xff] }
   0x2   :  { %v80_v1 = vld [vmem:[%s148_s0] ss:$0 sm:$0xff] }
   0x3   :  { %8 = vsyncpa [#allocation3], 0  ;;  %v20_v2 = vadd.f32 %v80_v1, %v15_v0  ;;  %v111_v3 = vmov 0   ;;  %v34_v5 = vld [vmem:[%s150_s2] sm:$0xff]  ;;  %v35_v11 = vlaneseq  ;;  %vm46_vm2 = vcmask 7168   ;;  %s112_s0 = smov [#allocation2]  }
   0x4   :  { %79 = vset.pattern.permute.xlu0 %v111_v3  ;;  %s64_s1 = sshll.u32 %s112_s0, 4  ;;  %s66_s19 = sshll.u32 %s151_s3, 4  ;;  %s65_s1 = int_to_ptr.vmem [resolvable:$true] %s64_s1  ;;  %s67_s19 = int_to_ptr.hbm [resolvable:$true] %s66_s19 }
   0x5   :  { %v22_v4 = vsel %vm21_vm0, %v20_v2, -inf  ;;  %v36_v12 = vand.u32 127, %v35_v11 }
   0x6   :  { %23 = vmax.xlane.f32.xlu0 %v22_v4 }
  0x1a   :  { %38 = vperm.xlu0 %79, %v34_v5  }
  0x79   :  { %v24_v6 = vpop.xlane.xlu0 %23 }
  0x7a   :  { %v25_v7 = vsub.f32 %v20_v2, %v24_v6 }
  0x7c   :  { %v26_v8 = vmul.f32 1.442695, %v25_v7 }
  0x7e   :  { %81 = vpow2.f32 %v26_v8 }
  0x84   :  { %v82_v9 = vpop.eup %81 }
  0x85   :  { %v28_v10 = vsel %vm21_vm0, %v82_v9, 0.0 }
  0x86   :  { %29 = vadd.xlane.f32.xlu1 %v28_v10 }
  0x8c   :  { %v39_v13 = vpop.permute.xlu0 %38 }
  0x8d   :  { %vm40_vm1 = vcmp.eq.s32.totalorder %v36_v12, %v39_v13 }
  0x8e   :  { %v41_v14 = vsel %vm40_vm1, %v20_v2, 0.0 }
  0x8f   :  { %v42_v15 = vsel %vm21_vm0, %v41_v14, 0.0 }
  0x90   :  { %43 = vadd.xlane.f32.xlu1 %v42_v15 }
  0xf9   :  { %v30_v16 = vpop.xlane.xlu1 %29 }
  0xfa   :  { %83 = vlog2.f32 %v30_v16 }
 0x100   :  { %v84_v17 = vpop.eup %83 }
 0x101   :  { %v32_v18 = vmul.f32 0.6931472, %v84_v17 }
 0x103   :  { %v33_v19 = vadd.f32 %v32_v18, %v24_v6  ;;  %v44_v20 = vpop.xlane.xlu1 %43 }
 0x105   :  { %v45_v21 = vsub.f32 %v33_v19, %v44_v20 }
 0x107   :  { %v47_v22 = vsel %vm46_vm2, %v45_v21, 0.0 }
 0x108   :  { %48 = vadd.xlane.f32.xlu2 %v47_v22 }
 0x17b   :  { %v49_v23 = vpop.xlane.xlu2 %48 }
 0x17c   :  { %v50_v24 = vrot.slane %v49_v23, 4 }
 0x17e   :  { %v51_v25 = vadd.f32 %v50_v24, %v49_v23 }
 0x180   :  { %v52_v26 = vrot.slane %v51_v25, 2 }
 0x182   :  { %v53_v27 = vadd.f32 %v52_v26, %v51_v25 }
 0x184   :  { %v54_v28 = vrot.slane %v53_v27, 1 }
 0x186   :  { %v55_v29 = vadd.f32 %v54_v28, %v53_v27 }
 0x188   :  { %75 = vpush %v55_v29 }
 0x1b9   :  { %s76_s20 = spop %75 }
 0x1ba   :  { %v57_v30 = vstv %s76_s20 }
 0x1bb   :  { %58 = vst [vmem:[#allocation2] sm:$0x1] %v57_v30 }
 0x1bc   :  { %69 = dma.vmem_to_hbm [thread:$0]  %s65_s1, 16, %s67_s19, [#allocation3]  }
 0x1bd   :  { %109 = dma.done.wait [#allocation3], 16  }
 0x1be   :  { %110 = vsyncadd [#allocation3], 4294967280 }
 0x1bf   :  { %74 = vsyncpa [#allocation3], 1 }

</bundles_post_ra>
